<compile_context>
chip_gen: v6e
topology: v6e:2x2x1
jax: 0.10.0
libtpu: 0.0.40
codegen_flags: <defaults>
</compile_context>

<pallas_src>
import jax
import jax.numpy as jnp
from jax.experimental import pallas as pl
from jax.experimental.pallas import tpu as pltpu


_LANE = 128
_MIN_TILE_M = 16  # bf16 native sublane tile; smallest M block emitted


def _round_up(a, b):
    return -(-a // b) * b


def _vmem_limits():
    """Generation-aware (scoped-VMEM request, tile-sizing budget) in bytes."""
    cap = None
    try:
        info = pltpu.get_tpu_info()
        for name in ("vmem_capacity_bytes", "vmem_size_bytes", "vmem_bytes"):
            cap = getattr(info, name, None)
            if cap:
                break
    except Exception:
        cap = None
    if cap is not None and cap >= 100 * 1024 * 1024:
        # 128-MiB-VMEM parts (v5e / v6e): bigger tiles, fewer grid steps, bigger DMAs.
        return 64 * 1024 * 1024, 48 * 1024 * 1024
    # v7x (64 MiB physical / 32 MiB scoped default) or unknown generation: conservative.
    return 32 * 1024 * 1024, 24 * 1024 * 1024


def _choose_tile_m(M, K, N, out_bytes, vmem_budget):
    """Largest sublane/MXU-aligned M tile that fits the VMEM budget, with >=2
    (ideally >=4) grid steps so the 'parallel' M axis splits across v7x's two
    TensorCores and DMAs pipeline on single-core parts.  tm never exceeds
    round_up(M, 16), so blocks never exceed the array extent."""
    in_bytes = 2  # bf16 activations / weight
    # Weight + bias are grid-invariant but conservatively charged double-buffered.
    fixed = 2 * K * N * in_bytes + 2 * N * 4
    # x tile (double-buffered) + out tile (double-buffered) + f32 accumulator temp.
    per_row = 2 * K * in_bytes + 2 * N * out_bytes + N * 4
    cap = max(_MIN_TILE_M, (vmem_budget - fixed) // per_row)
    m_cap = _round_up(M, _MIN_TILE_M)
    if M >= 4 * _MIN_TILE_M:
        min_steps = 4
    elif M > _MIN_TILE_M:
        min_steps = 2
    else:
        min_steps = 1
    for cand in (4096, 2048, 1024, 512, 256, 128, 64, 32, 16):
        if cand > cap or cand > m_cap:
            continue
        if pl.cdiv(M, cand) < min_steps:
            continue
        return cand
    return _MIN_TILE_M


def _patch_embed_matmul_kernel(x_ref, w_ref, b_ref, o_ref):
    # x_ref: (tm, K) bf16, w_ref: (K, N) bf16, b_ref: (1, N) f32, o_ref: (tm, N).
    acc = jnp.dot(x_ref[...], w_ref[...], preferred_element_type=jnp.float32)
    o_ref[...] = (acc + b_ref[...]).astype(o_ref.dtype)


def _matmul_bias(patches, w_mat, bias, out_dtype):
    """(M, K) @ (K, N) + (1, N) via pallas_call, tiled over M with a cdiv grid
    (ragged last block handled by Pallas masking; no full-array padding)."""
    M, K = patches.shape
    K2, N = w_mat.shape
    assert K == K2 and K % _LANE == 0 and N % _LANE == 0

    # Only tiny inputs (M < 16) get padded, so blocks never exceed the array.
    Mp = max(M, _MIN_TILE_M)
    if Mp != M:
        patches = jnp.pad(patches, ((0, Mp - M), (0, 0)))

    vmem_limit, vmem_budget = _vmem_limits()
    out_bytes = jnp.dtype(out_dtype).itemsize
    tm = _choose_tile_m(Mp, K, N, out_bytes, vmem_budget)
    grid = (pl.cdiv(Mp, tm),)

    cost = pl.CostEstimate(
        flops=2 * Mp * K * N,
        transcendentals=0,
        bytes_accessed=(Mp * K * patches.dtype.itemsize
                        + K * N * w_mat.dtype.itemsize
                        + N * bias.dtype.itemsize
                        + Mp * N * out_bytes),
    )

    out = pl.pallas_call(
        _patch_embed_matmul_kernel,
        out_shape=jax.ShapeDtypeStruct((Mp, N), out_dtype),
        grid_spec=pltpu.PrefetchScalarGridSpec(
            num_scalar_prefetch=0,
            grid=grid,
            in_specs=[
                pl.BlockSpec((tm, K), lambda i: (i, 0)),
                pl.BlockSpec((K, N), lambda i: (0, 0)),   # grid-invariant weight
                pl.BlockSpec((1, N), lambda i: (0, 0)),   # grid-invariant bias
            ],
            out_specs=pl.BlockSpec((tm, N), lambda i: (i, 0)),
        ),
        compiler_params=pltpu.CompilerParams(
            dimension_semantics=("parallel",),
            vmem_limit_bytes=vmem_limit,
            # Let XLA fuse the patchify layout shuffle into the kernel's x operand.
            allow_input_fusion=[True, False, False],
        ),
        cost_estimate=cost,
    )(patches, w_mat, bias)

    return out[:M] if Mp != M else out


def patch_embed_forward(x, weight, bias, patch_size, out_dtype=jnp.bfloat16):
    """Forward of PatchEmbed.

    x      : (B, C, T, H, W) float32
    weight : (embed_dim, C, ph, pw)   -- Conv2d weight
    bias   : (embed_dim,)             -- Conv2d bias
    Returns (tokens, T, W_out, sizes) like the PyTorch module:
      tokens: (B*T, num_patches, embed_dim), W_out = W // pw, sizes = x.shape.

    NOTE: activations/weights are computed in bf16 with f32 accumulation and the
    tokens are emitted in bf16 (downstream transformer dtype) -- numerics differ
    from the f32 PyTorch Conv2d by ~1e-2 relative.  Pass out_dtype=jnp.float32
    for an f32 token stream.
    """
    B, C, T, H, W = x.shape
    ph, pw = patch_size
    Hp, Wp = H // ph, W // pw
    embed_dim = weight.shape[0]
    sizes = (B, C, T, H, W)
    compute_dtype = jnp.bfloat16

    K = C * ph * pw
    Kp = _round_up(K, _LANE)
    Np = _round_up(embed_dim, _LANE)

    # Single XLA pass over the activations: cast to bf16 (half the bytes moved),
    # patchify 'b c t h w -> (b t hp wp) (c ph pw)', and pad K to a lane multiple
    # so the kernel's x loads are lane-dense.
    xr = x.astype(compute_dtype).reshape(B, C, T, Hp, ph, Wp, pw)
    patches = jnp.transpose(xr, (0, 2, 3, 5, 1, 4, 6))          # (B,T,Hp,Wp,C,ph,pw)
    patches = patches.reshape(B * T * Hp * Wp, K)               # (M, K) bf16
    if Kp != K:
        patches = jnp.pad(patches, ((0, 0), (0, Kp - K)))

    # Weight (Kp, Np) in bf16 (zero rows/cols in the padded region), bias (1, Np) f32.
    w_mat = weight.reshape(embed_dim, K).T.astype(compute_dtype)  # (K, N)
    b_mat = bias.astype(jnp.float32).reshape(1, embed_dim)
    if Kp != K:
        w_mat = jnp.pad(w_mat, ((0, Kp - K), (0, 0)))
    if Np != embed_dim:
        w_mat = jnp.pad(w_mat, ((0, 0), (0, Np - embed_dim)))
        b_mat = jnp.pad(b_mat, ((0, 0), (0, Np - embed_dim)))

    out = _matmul_bias(patches, w_mat, b_mat, out_dtype=out_dtype)      # (M, Np)
    tokens = out[:, :embed_dim].reshape(B * T, Hp * Wp, embed_dim)      # flatten(2).T
    return tokens, T, Wp, sizes


def _reference(x, weight, bias, patch_size):
    """Plain-JAX f32 reference (conv as patchify + matmul)."""
    B, C, T, H, W = x.shape
    ph, pw = patch_size
    Hp, Wp = H // ph, W // pw
    e = weight.shape[0]
    xf = jnp.transpose(x, (0, 2, 1, 3, 4)).reshape(B * T, C, H, W)
    pr = xf.reshape(B * T, C, Hp, ph, Wp, pw)
    pr = jnp.transpose(pr, (0, 2, 4, 1, 3, 5)).reshape(B * T * Hp * Wp, -1)
    return (pr @ weight.reshape(e, -1).T + bias).reshape(B * T, Hp * Wp, e)


def _run_case(key, B, C, T, H, W, patch_size, embed_dim, tol=5e-2):
    ph, pw = patch_size
    kx, kw, kb = jax.random.split(key, 3)
    x = jax.random.normal(kx, (B, C, T, H, W), dtype=jnp.float32)
    fan_in = C * ph * pw
    bound = 1.0 / (fan_in ** 0.5)
    weight = jax.random.uniform(kw, (embed_dim, C, ph, pw), dtype=jnp.float32,
                                minval=-bound, maxval=bound)
    bias = jax.random.uniform(kb, (embed_dim,), dtype=jnp.float32,
                              minval=-bound, maxval=bound)

    tokens, T_out, W_out, sizes = patch_embed_forward(x, weight, bias, patch_size)
    tokens = jax.block_until_ready(tokens)

    Hp, Wp = H // ph, W // pw
    ref = _reference(x, weight, bias, patch_size)
    assert tokens.shape == (B * T, Hp * Wp, embed_dim)
    assert tokens.dtype == jnp.bfloat16
    assert T_out == T and W_out == Wp and sizes == (B, C, T, H, W)
    # bf16 inputs/outputs, f32 accumulation -> loose tolerance vs. f32 reference.
    err = float(jnp.max(jnp.abs(tokens.astype(jnp.float32) - ref)))
    assert bool(jnp.allclose(tokens.astype(jnp.float32), ref, atol=tol, rtol=tol)), err


if __name__ == "__main__":
    key = jax.random.PRNGKey(0)
    k1, k2, k3 = jax.random.split(key, 3)

    # Case 1: module-consistent small shapes; exact single-tile grid.
    _run_case(k1, B=2, C=4, T=2, H=16, W=16, patch_size=(8, 8), embed_dim=32)

    # Case 2: ragged M (45 tokens), K=192->256 pad, embed_dim=40->128 pad, 2 grid steps.
    _run_case(k2, B=1, C=3, T=5, H=24, W=24, patch_size=(8, 8), embed_dim=40)

    # Case 3: multi-step 'parallel' grid (128 tokens -> 4 steps), embed_dim=48->128 pad.
    _run_case(k3, B=2, C=3, T=4, H=32, W=32, patch_size=(8, 8), embed_dim=48)

    print("KERNEL_OK")
</pallas_src>

<mosaic_0001>
module attributes {stable_mosaic.version = 11 : i64} {
  func.func @_patch_embed_matmul_kernel(%arg0: i32, %arg1: memref<16x256xbf16, #tpu.memory_space<vmem>>, %arg2: memref<256x128xbf16, #tpu.memory_space<vmem>>, %arg3: memref<1x128xf32, #tpu.memory_space<vmem>>, %arg4: memref<16x128xbf16, #tpu.memory_space<vmem>>) attributes {dimension_semantics = [#tpu.dimension_semantics<parallel>], iteration_bounds = array<i64: 1>, scalar_prefetch = 0 : i64, scratch_operands = 0 : i64, tpu.core_type = #tpu.core_type<tc>, window_params = [{transform_indices = @transform_0, window_bounds = array<i64: 16, 256>}, {pipeline_mode = #tpu.pipeline_mode<synchronous>, transform_indices = @transform_1, window_bounds = array<i64: 256, 128>}, {pipeline_mode = #tpu.pipeline_mode<synchronous>, transform_indices = @transform_2, window_bounds = array<i64: 1, 128>}, {transform_indices = @transform_3, window_bounds = array<i64: 16, 128>}]} {
    %c0 = arith.constant 0 : index
    %c0_0 = arith.constant 0 : index
    %0 = vector.load %arg1[%c0, %c0_0] : memref<16x256xbf16, #tpu.memory_space<vmem>>, vector<16x256xbf16>
    %c0_1 = arith.constant 0 : index
    %c0_2 = arith.constant 0 : index
    %1 = vector.load %arg2[%c0_1, %c0_2] : memref<256x128xbf16, #tpu.memory_space<vmem>>, vector<256x128xbf16>
    %cst = arith.constant dense<0.000000e+00> : vector<16x128xf32>
    %2 = tpu.matmul %0, %1, %cst {dimension_numbers = #tpu.dot_dimension_numbers<[1], [0], [0], [1], [0, 0, 1, 1], [], []>} : vector<16x256xbf16>, vector<256x128xbf16>, vector<16x128xf32> -> vector<16x128xf32>
    %c0_3 = arith.constant 0 : index
    %c0_4 = arith.constant 0 : index
    %3 = vector.load %arg3[%c0_3, %c0_4] : memref<1x128xf32, #tpu.memory_space<vmem>>, vector<1x128xf32>
    %4 = vector.broadcast %3 : vector<1x128xf32> to vector<16x128xf32>
    %5 = arith.addf %2, %4 : vector<16x128xf32>
    %6 = arith.truncf %5 : vector<16x128xf32> to vector<16x128xbf16>
    %c0_5 = arith.constant 0 : index
    %c0_6 = arith.constant 0 : index
    %7 = vector.load %arg4[%c0_5, %c0_6] : memref<16x128xbf16, #tpu.memory_space<vmem>>, vector<16x128xbf16>
    tpu.vector_store %arg4[%c0_5, %c0_6], %6 {strides = array<i32>} : memref<16x128xbf16, #tpu.memory_space<vmem>>, vector<16x128xbf16>,
    return
  }
  func.func @transform_0(%arg0: i32) -> (i32, i32) {
    %c0_i32 = arith.constant 0 : i32
    %c0_i32_0 = arith.constant 0 : i32
    return %arg0, %c0_i32 : i32, i32
  }
  func.func @transform_1(%arg0: i32) -> (i32, i32) {
    %c0_i32 = arith.constant 0 : i32
    %c0_i32_0 = arith.constant 0 : i32
    %c0_i32_1 = arith.constant 0 : i32
    return %c0_i32, %c0_i32_0 : i32, i32
  }
  func.func @transform_2(%arg0: i32) -> (i32, i32) {
    %c0_i32 = arith.constant 0 : i32
    %c0_i32_0 = arith.constant 0 : i32
    %c0_i32_1 = arith.constant 0 : i32
    return %c0_i32, %c0_i32_0 : i32, i32
  }
  func.func @transform_3(%arg0: i32) -> (i32, i32) {
    %c0_i32 = arith.constant 0 : i32
    %c0_i32_0 = arith.constant 0 : i32
    return %arg0, %c0_i32 : i32, i32
  }
}

</mosaic_0001>

<bundles_post_ra>
// kernel: tpu_custom_call.1
= control target key start
LH: loop header
LB: loop body
LE: loop exit
PB: predicated region body
PF: predicated region fallthrough
CT: control target
= control target key end

     0   :  { %8 = vsyncpa [#allocation3], 0  ;;  %s447_s0 = inlined_call_operand.hbm [shape: bf16[16,256], index: 0, kind: input, shape index: {}]   ;;  %s448_s1 = inlined_call_operand.hbm [shape: bf16[256,128], index: 1, kind: input, shape index: {}]   ;;  %s449_s2 = inlined_call_operand.vmem [shape: f32[1,128], index: 2, kind: input, shape index: {}]   ;;  %s450_s3 = inlined_call_operand.hbm [shape: bf16[16,128], index: 3, kind: output, shape index: {}]  }
   0x1   :  { %9 = vsyncpa [#allocation6], 0 }
   0x2   :  { %10 = vsyncpa [#allocation4], 0  ;;  %s402_s12 = smov [#allocation2]  }
   0x3   :  { %s16_s13 = sshll.u32 %s402_s12, 4  ;;  %s17_s13 = int_to_ptr.vmem [resolvable:$true] %s16_s13 }
   0x4   :  { %s344_s14 = scalar_lea.vmem %s17_s13, 256  ;;  %p349_p1 = scmp.lt.s32.totalorder %s17_s13, %s17_s13 }
   0x5   :  { %p345_p0 = scmp.ne.s32.totalorder %s17_s13, %s344_s14  ;;  %p350_p2 = scmp.lt.s32.totalorder %s344_s14, %s344_s14 }
   0x7   :  { %p351_p3 = por %p350_p2, %p349_p1 }
   0x9   :  { %p352_p4 = pnand %p351_p3, %p345_p0 }
   0xb   :  { %355 = shalt.err (!%p352_p4)
}
   0xc   :  { %s403_s15 = smov 128   ;;  %s404_s16 = smov 8  }
   0xd   :  { %22 = dma.hbm_to_vmem [thread:$0]  %s447_s0, 256, %s17_s13, [#allocation3], %s403_s15, %s403_s15, %s404_s16  }
   0xe   :  { %s405_s19 = smov [#allocation5]  }
   0xf   :  { %s28_s20 = sshll.u32 %s405_s19, 4  ;;  %s29_s20 = int_to_ptr.vmem [resolvable:$true] %s28_s20 }
  0x10   :  { %s364_s21 = scalar_lea.vmem %s29_s20, 2048  ;;  %p369_p6 = scmp.lt.s32.totalorder %s29_s20, %s29_s20 }
  0x11   :  { %p365_p5 = scmp.ne.s32.totalorder %s29_s20, %s364_s21  ;;  %p370_p7 = scmp.lt.s32.totalorder %s364_s21, %s364_s21 }
  0x13   :  { %p371_p8 = por %p370_p7, %p369_p6 }
  0x15   :  { %p372_p9 = pnand %p371_p8, %p365_p5 }
  0x17   :  { %375 = shalt.err (!%p372_p9)
}
  0x18   :  { %s406_s22 = smov 64   ;;  %s407_s23 = smov 4  }
  0x19   :  { %34 = dma.hbm_to_vmem [thread:$0]  %s448_s1, 2048, %s29_s20, [#allocation6], %s406_s22, %s406_s22, %s407_s23  }
  0x1a   :  { %396 = dma.done.wait [#allocation3], 256  }
  0x1b   :  { %397 = vsyncadd [#allocation3], 4294967040 }
  0x1c   :  { %398 = dma.done.wait [#allocation6], 2048  }
  0x1d   :  { %399 = vsyncadd [#allocation6], 4294965248  ;;  %v317_v0 = vld [vmem:[#allocation5 + $0x78] sm:$0xff]   ;;  %v319_v2 = vld [vmem:[#allocation5 + $0x70] sm:$0xff]   ;;  %s408_s26 = smov [#allocation7]  }
  0x1e   :  { %v318_v1 = vld [vmem:[#allocation5 + $0x38] sm:$0xff]   ;;  %288 = vmatprep.subr.bf16.mxu0 %v317_v0  ;;  %v320_v3 = vld [vmem:[#allocation5 + $0x30] sm:$0xff]   ;;  %v321_v4 = vld [vmem:[#allocation5 + $0x68] sm:$0xff]   ;;  %s247_s27 = sshll.u32 %s408_s26, 4  ;;  %s248_s27 = int_to_ptr.vmem [resolvable:$true] %s247_s27 }
  0x1f   :  { %289 = vmatpush3.bf16.msra.mxu0 %v318_v1  ;;  %v322_v5 = vld [vmem:[#allocation5 + $0x28] sm:$0xff]   ;;  %v323_v6 = vld [vmem:[#allocation5 + $0x60] sm:$0xff]   ;;  %v325_v8 = vld [vmem:[#allocation5 + $0x58] sm:$0xff]   ;;  %s376_s28 = scalar_lea.vmem %s248_s27, 128  ;;  %p381_p11 = scmp.lt.s32.totalorder %s248_s27, %s248_s27 }
  0x20   :  { %290 = vmatprep.subr.bf16.mxu0 %v319_v2  ;;  %v324_v7 = vld [vmem:[#allocation5 + $0x20] sm:$0xff]   ;;  %v326_v9 = vld [vmem:[#allocation5 + $0x18] sm:$0xff]   ;;  %v327_v10 = vld [vmem:[#allocation5 + $0x50] sm:$0xff]   ;;  %p377_p10 = scmp.ne.s32.totalorder %s248_s27, %s376_s28  ;;  %p382_p12 = scmp.lt.s32.totalorder %s376_s28, %s376_s28 }
  0x21   :  { %v335_v11 = vld [vmem:[#allocation2 + $0x4] ss:$8 sps:$4 sm:$0xff]   ;;  %v329_v13 = vld [vmem:[#allocation5 + $0x48] sm:$0xff]   ;;  %v331_v15 = vld [vmem:[#allocation5 + $0x40] sm:$0xff]  }
  0x22   :  { %v328_v12 = vld [vmem:[#allocation5 + $0x10] sm:$0xff]   ;;  %223 = vmatprep.mubr.bf16.mxu0 %v335_v11  ;;  %v330_v14 = vld [vmem:[#allocation5 + $0x8] sm:$0xff]   ;;  %v332_v16 = vld [vmem:[#allocation5] sm:$0xff]   ;;  %p383_p13 = por %p382_p12, %p381_p11 }
  0x23   :  { %291 = vmatpush3.bf16.msra.mxu0 %v320_v3  ;;  %v333_v17 = vld [vmem:[#allocation2] ss:$8 sps:$4 sm:$0xff]  }
  0x24   :  { %292 = vmatprep.subr.bf16.mxu0 %v321_v4  ;;  %v260_v22 = vld [vmem:[%s449_s2] ss:$0 sm:$0xff]  ;;  %p384_p0 = pnand %p383_p13, %p377_p10 }
  0x27   :  { %293 = vmatpush3.bf16.msra.mxu0 %v322_v5 }
  0x28   :  { %294 = vmatprep.subr.bf16.mxu0 %v323_v6 }
  0x2b   :  { %295 = vmatpush3.bf16.msra.mxu0 %v324_v7 }
  0x2c   :  { %296 = vmatprep.subr.bf16.mxu0 %v325_v8 }
  0x2f   :  { %297 = vmatpush3.bf16.msra.mxu0 %v326_v9 }
  0x30   :  { %298 = vmatprep.subr.bf16.mxu0 %v327_v10 }
  0x33   :  { %299 = vmatpush3.bf16.msra.mxu0 %v328_v12 }
  0x34   :  { %300 = vmatprep.subr.bf16.mxu0 %v329_v13 }
  0x37   :  { %301 = vmatpush3.bf16.msra.mxu0 %v330_v14 }
  0x38   :  { %302 = vmatprep.subr.bf16.mxu0 %v331_v15 }
  0x3b   :  { %303 = vmatpush3.bf16.msra.mxu0 %v332_v16 }
  0x3e   :  { %224 = vmatmul.mubr.bf16.vlgmr.msra.gmra.mxu0 %v333_v17 }
  0xfe   :  { %v304_v18 = vpop.f32.mrf.mxu0 }
 0x100   :  { %v305_v19 = vpop.f32.mrf.mxu0 }
 0x101   :  { %v306_v21 = vadd.f32 %v305_v19, %v304_v18 }
 0x102   :  { %v307_v20 = vpop.f32.mrf.mxu0 }
 0x103   :  { %v226_v25 = vadd.f32 %v306_v21, %v260_v22 }
 0x104   :  { %v308_v23 = vpop.f32.mrf.mxu0 }
 0x105   :  { %v309_v24 = vadd.f32 %v308_v23, %v307_v20 }
 0x107   :  { %v229_v26 = vadd.f32 %v309_v24, %v260_v22 }
 0x109   :  { %v286_v27 = vpack.c.bf16 %v229_v26, %v226_v25 }
 0x10b   :  { %287 = vst [vmem:[#allocation7] sm:$0xff] %v286_v27  }
 0x10c   :  { %387 = shalt.err (!%p384_p0)
}
 0x10d   :  { %253 = dma.vmem_to_hbm [thread:$0]  %s248_s27, 128, %s450_s3, [#allocation4], %s406_s22, %s406_s22, %s407_s23  }
 0x10e   :  { %400 = dma.done.wait [#allocation4], 128  }
 0x10f   :  { %401 = vsyncadd [#allocation4], 4294967168 }
 0x110   :  { %257 = vsyncpa [#allocation3], 1 }
 0x111   :  { %258 = vsyncpa [#allocation6], 1 }
 0x112   :  { %259 = vsyncpa [#allocation4], 1 }

</bundles_post_ra>
